<compile_context>
chip_gen: v7x
topology: tpu7x:2x2x1
jax: 0.10.0
libtpu: 0.0.40
codegen_flags: <defaults>
</compile_context>

<pallas_src>
import functools

import jax
import jax.numpy as jnp
from jax import lax
from jax.experimental import pallas as pl
from jax.experimental.pallas import tpu as pltpu

OBS_X, OBS_Y, RADIUS = 40.0, 15.0, 6.0


def _round_up(x, m):
    return ((x + m - 1) // m) * m


def barriernet_kernel(x_ref, w_ref, b_ref, out_ref, *, H1, HA, H2sum, r2, r3, nCls):
    F = x_ref.shape[1]
    x = x_ref[...]                                      # (TB, F) natural (batch, feature)

    # ---- mm1: fused [fc1 ; std-scaled state selector] --------------------------------
    # y1 = [W1 ; diag(std[:4])] @ x^T + [b1 ; mean[:4]]  -> (HA, TB), batch lane-dense.
    # Contracting the feature dim of BOTH operands (trans_b) keeps x unpadded/untransposed
    # in HBM while every result row is lane-dense over the batch.
    wa = w_ref[0:HA, 0:F]
    ba = b_ref[0:HA, :]
    y1 = lax.dot_general(wa, x, (((1,), (1,)), ((), ())),
                         preferred_element_type=jnp.float32) + ba
    h1 = jnp.maximum(y1[0:H1, :], 0.0)                  # (H1, TB) = relu(fc1(x))^T
    x0 = y1[H1:H1 + 4, :]                               # (4, TB) de-normed [px; py; theta; v]

    # ---- mm2: fused [fc21 ; fc22] ------------------------------------------------------
    w2 = w_ref[r2:r2 + H2sum, 0:H1]
    b2 = b_ref[r2:r2 + H2sum, :]
    h2 = jnp.maximum(jnp.dot(w2, h1, preferred_element_type=jnp.float32) + b2, 0.0)

    # ---- mm3: fused blockdiag [fc31 ; fc32] --------------------------------------------
    w3 = w_ref[r3:r3 + 2 * nCls, 0:H2sum]
    b3 = b_ref[r3:r3 + 2 * nCls, :]
    y3 = jnp.dot(w3, h2, preferred_element_type=jnp.float32) + b3      # (2*nCls, TB)

    q1 = y3[0:1, :]                                     # x31^T (QP linear term p)
    q2 = y3[1:2, :]
    p1 = 4.0 * jax.nn.sigmoid(y3[nCls:nCls + 1, :])     # x32^T = 4*sigmoid(fc32(...))
    p2 = 4.0 * jax.nn.sigmoid(y3[nCls + 1:nCls + 2, :])

    # ---- dCBF constraint construction: all (1, TB) lane-dense rows ---------------------
    px, py = x0[0:1, :], x0[1:2, :]
    theta, v = x0[2:3, :], x0[3:4, :]
    st, ct = jnp.sin(theta), jnp.cos(theta)
    dx, dy = px - OBS_X, py - OBS_Y
    barrier = dx * dx + dy * dy - RADIUS * RADIUS
    barrier_dot = 2.0 * dx * v * ct + 2.0 * dy * v * st
    lf2b = 2.0 * v * v
    g1 = -(-2.0 * dx * v * st + 2.0 * dy * v * ct)      # -LgLfbu1
    g2 = -(2.0 * dx * ct + 2.0 * dy * st)               # -LgLfbu2
    h = lf2b + (p1 + p2) * barrier_dot + p1 * p2 * barrier

    # ---- QP: min 0.5 u^T u + q^T u  s.t.  G u <= h  (closed form, Q = I) ---------------
    g_dot_neg_p = -(g1 * q1 + g2 * q2)
    gg = jnp.maximum(g1 * g1 + g2 * g2, 1e-12)
    # exact reciprocal: approx=True (+NR) only matters if VALU is binding, which it is
    # not after the lane-dense restructure; exact keeps the 1e-4 parity margin.
    inv_gg = pl.reciprocal(gg, approx=False)
    lam = jnp.maximum((g_dot_neg_p - h) * inv_gg, 0.0)
    u1 = -q1 - lam * g1
    u2 = -q2 - lam * g2
    out_ref[...] = jnp.concatenate([u1, u2], axis=0)    # (nCls, TB) single lane-dense store


def _pick_block_b(B, cap=1024):
    Bs = _round_up(B, 8)
    if Bs <= 128:
        return Bs                 # single grid step: launch-latency-bound regime
    # >= 2 grid steps so both v7x TensorCores get work; 128-multiples keep the lane-dense
    # output block legal; cap=1024 amortizes per-step overhead on single-TC v5e/v6e.
    return int(min(cap, _round_up((B + 1) // 2, 128)))


def barriernet_forward(x, mean, std,
                       w1, b1, w21, b21, w22, b22, w31, b31, w32, b32,
                       sgn=1, block_b=None):
    # Both the training/sgn==1 (batched QPFunction) and the eval (per-sample cvx solver)
    # branches of the PyTorch forward solve the same single-constraint QP; the closed
    # form in the kernel covers both.
    del sgn
    f32 = jnp.float32
    B, F = x.shape
    H1 = w1.shape[1]
    H21 = w21.shape[1]
    H22 = w22.shape[1]
    H2sum = H21 + H22
    nCls = w31.shape[1]
    assert nCls == 2, "dCBF math in the module is only defined for nCls == 2"
    assert F >= 4, "state layout requires at least [px, py, theta, v]"

    if block_b is None:
        block_b = _pick_block_b(B)
    block_b = _round_up(block_b, 8)
    if block_b < B:                       # multiple grid steps -> 128-multiple lane tiles
        block_b = _round_up(block_b, 128)
    n_steps = pl.cdiv(B, block_b)
    Bp = n_steps * block_b

    # ---- pack the 12 parameters (+ mean/std) into 2 grid-invariant slabs ---------------
    HA = _round_up(H1 + 4, 8)                      # fc1 rows + 4 state-selector rows
    r2 = HA                                        # fc21/fc22 rows
    r3 = HA + _round_up(H2sum, 8)                  # fc31/fc32 rows
    rows = r3 + _round_up(2 * nCls, 8)
    cols = _round_up(max(F, H1, H2sum), 128)

    meanv = jnp.asarray(mean, f32).reshape(-1)
    stdv = jnp.asarray(std, f32).reshape(-1)
    sel = jnp.zeros((4, F), f32).at[jnp.arange(4), jnp.arange(4)].set(stdv[:4])

    wslab = (jnp.zeros((rows, cols), f32)
             .at[0:H1, 0:F].set(jnp.asarray(w1, f32).T)               # fc1 (out, in)
             .at[H1:H1 + 4, 0:F].set(sel)                              # de-norm selector
             .at[r2:r2 + H21, 0:H1].set(jnp.asarray(w21, f32).T)
             .at[r2 + H21:r2 + H2sum, 0:H1].set(jnp.asarray(w22, f32).T)
             .at[r3:r3 + nCls, 0:H21].set(jnp.asarray(w31, f32).T)
             .at[r3 + nCls:r3 + 2 * nCls, H21:H2sum].set(jnp.asarray(w32, f32).T))
    bslab = (jnp.zeros((rows, 1), f32)
             .at[0:H1, 0].set(jnp.asarray(b1, f32).reshape(-1))
             .at[H1:H1 + 4, 0].set(meanv[:4])
             .at[r2:r2 + H21, 0].set(jnp.asarray(b21, f32).reshape(-1))
             .at[r2 + H21:r2 + H2sum, 0].set(jnp.asarray(b22, f32).reshape(-1))
             .at[r3:r3 + nCls, 0].set(jnp.asarray(b31, f32).reshape(-1))
             .at[r3 + nCls:r3 + 2 * nCls, 0].set(jnp.asarray(b32, f32).reshape(-1)))

    kernel = functools.partial(barriernet_kernel, H1=H1, HA=HA, H2sum=H2sum,
                               r2=r2, r3=r3, nCls=nCls)

    out_t = pl.pallas_call(
        kernel,
        grid=(n_steps,),
        in_specs=[
            # x stays unpadded in natural (B, F) layout; tail block is ragged (computed
            # on unspecified rows, whose columns are sliced off below — per-column math
            # only, so nothing leaks into valid rows).
            pl.BlockSpec((block_b, F), lambda i: (i, 0)),
            pl.BlockSpec((rows, cols), lambda i: (0, 0)),   # weight slab, grid-invariant
            pl.BlockSpec((rows, 1), lambda i: (0, 0)),      # bias slab, grid-invariant
        ],
        out_specs=pl.BlockSpec((nCls, block_b), lambda i: (0, i)),     # lane-dense output
        out_shape=jax.ShapeDtypeStruct((nCls, Bp), f32),
        compiler_params=pltpu.CompilerParams(dimension_semantics=("parallel",)),
    )(jnp.asarray(x, f32), wslab, bslab)

    # tiny (nCls, B) -> (B, nCls); negligible vs. the kernel itself.
    return out_t[:, :B].T


def _reference_forward(x, mean, std, w1, b1, w21, b21, w22, b22, w31, b31, w32, b32):
    x0 = x * std + mean
    h1 = jax.nn.relu(x @ w1 + b1)
    h21 = jax.nn.relu(h1 @ w21 + b21)
    h22 = jax.nn.relu(h1 @ w22 + b22)
    x31 = h21 @ w31 + b31
    x32 = 4.0 * jax.nn.sigmoid(h22 @ w32 + b32)
    px, py, theta, v = x0[:, 0:1], x0[:, 1:2], x0[:, 2:3], x0[:, 3:4]
    st, ct = jnp.sin(theta), jnp.cos(theta)
    dx, dy = px - OBS_X, py - OBS_Y
    barrier = dx * dx + dy * dy - RADIUS ** 2
    barrier_dot = 2 * dx * v * ct + 2 * dy * v * st
    lf2b = 2 * v * v
    lg1 = -2 * dx * v * st + 2 * dy * v * ct
    lg2 = 2 * dx * ct + 2 * dy * st
    G = jnp.concatenate([-lg1, -lg2], axis=1)
    h = lf2b + (x32[:, 0:1] + x32[:, 1:2]) * barrier_dot + x32[:, 0:1] * x32[:, 1:2] * barrier
    p = x31
    lam = jnp.maximum((jnp.sum(G * (-p), axis=1, keepdims=True) - h)
                      / jnp.maximum(jnp.sum(G * G, axis=1, keepdims=True), 1e-12), 0.0)
    return -p - lam * G


if __name__ == "__main__":
    # Small, deterministic config consistent with the module's __init__.
    nFeatures, nHidden1, nHidden21, nHidden22, nCls = 5, 32, 32, 32, 2

    key = jax.random.PRNGKey(0)
    ks = jax.random.split(key, 12)

    def linear_init(kw, kb, fan_in, fan_out):
        bound = 1.0 / jnp.sqrt(fan_in)
        w = jax.random.uniform(kw, (fan_in, fan_out), jnp.float32, -bound, bound)
        b = jax.random.uniform(kb, (1, fan_out), jnp.float32, -bound, bound)
        return w, b

    w1, b1 = linear_init(ks[0], ks[1], nFeatures, nHidden1)
    w21, b21 = linear_init(ks[2], ks[3], nHidden1, nHidden21)
    w22, b22 = linear_init(ks[4], ks[5], nHidden1, nHidden22)
    w31, b31 = linear_init(ks[6], ks[7], nHidden21, nCls)
    w32, b32 = linear_init(ks[8], ks[9], nHidden22, nCls)

    mean = jnp.array([[40.0, 12.0, 0.0, 1.0, 10.0]], jnp.float32)   # (1, nFeatures)
    std = jnp.array([[15.0, 10.0, 1.0, 2.0, 5.0]], jnp.float32)     # (1, nFeatures)

    # Primary check: tiny batch, single grid step.
    B = 16
    x = jax.random.normal(ks[10], (B, nFeatures), jnp.float32)
    out = jax.block_until_ready(
        barriernet_forward(x, mean, std, w1, b1, w21, b21, w22, b22, w31, b31, w32, b32, sgn=1))
    ref = _reference_forward(x, mean, std, w1, b1, w21, b21, w22, b22, w31, b31, w32, b32)
    assert out.shape == (B, nCls)
    assert jnp.allclose(out, ref, atol=1e-4, rtol=1e-4)

    # Secondary check: multi-step grid (2 x 128 blocks) with a ragged tail block.
    B2 = 200
    x2 = jax.random.normal(ks[11], (B2, nFeatures), jnp.float32)
    out2 = jax.block_until_ready(
        barriernet_forward(x2, mean, std, w1, b1, w21, b21, w22, b22, w31, b31, w32, b32, sgn=1))
    ref2 = _reference_forward(x2, mean, std, w1, b1, w21, b21, w22, b22, w31, b31, w32, b32)
    assert out2.shape == (B2, nCls)
    assert jnp.allclose(out2, ref2, atol=1e-4, rtol=1e-4)

    print("KERNEL_OK")
</pallas_src>

<mosaic_0001>
module attributes {stable_mosaic.version = 11 : i64} {
  func.func @barriernet_kernel(%arg0: i32, %arg1: memref<16x5xf32, #tpu.memory_space<vmem>>, %arg2: memref<112x128xf32, #tpu.memory_space<vmem>>, %arg3: memref<112x1xf32, #tpu.memory_space<vmem>>, %arg4: memref<2x16xf32, #tpu.memory_space<vmem>>) attributes {dimension_semantics = [#tpu.dimension_semantics<parallel>], iteration_bounds = array<i64: 1>, scalar_prefetch = 0 : i64, scratch_operands = 0 : i64, tpu.core_type = #tpu.core_type<tc>, window_params = [{transform_indices = @transform_0, window_bounds = array<i64: 16, 5>}, {pipeline_mode = #tpu.pipeline_mode<synchronous>, transform_indices = @transform_1, window_bounds = array<i64: 112, 128>}, {pipeline_mode = #tpu.pipeline_mode<synchronous>, transform_indices = @transform_2, window_bounds = array<i64: 112, 1>}, {transform_indices = @transform_3, window_bounds = array<i64: 2, 16>}]} {
    %c0 = arith.constant 0 : index
    %c0_0 = arith.constant 0 : index
    %0 = vector.load %arg1[%c0, %c0_0] : memref<16x5xf32, #tpu.memory_space<vmem>>, vector<16x5xf32>
    %c0_1 = arith.constant 0 : index
    %c0_2 = arith.constant 0 : index
    %1 = vector.load %arg2[%c0_1, %c0_2] : memref<112x128xf32, #tpu.memory_space<vmem>>, vector<40x5xf32>
    %c0_3 = arith.constant 0 : index
    %c0_4 = arith.constant 0 : index
    %2 = vector.load %arg3[%c0_3, %c0_4] : memref<112x1xf32, #tpu.memory_space<vmem>>, vector<40x1xf32>
    %cst = arith.constant dense<0.000000e+00> : vector<40x16xf32>
    %3 = tpu.matmul %1, %0, %cst {dimension_numbers = #tpu.dot_dimension_numbers<[1], [1], [0], [0], [0, 0, 1, 0], [], []>} : vector<40x5xf32>, vector<16x5xf32>, vector<40x16xf32> -> vector<40x16xf32>
    %4 = vector.broadcast %2 : vector<40x1xf32> to vector<40x16xf32>
    %5 = arith.addf %3, %4 : vector<40x16xf32>
    %6 = vector.extract_strided_slice %5 {offsets = [0, 0], sizes = [32, 16], strides = [1, 1]} : vector<40x16xf32> to vector<32x16xf32>
    %cst_5 = arith.constant 0.000000e+00 : f32
    %7 = vector.broadcast %cst_5 : f32 to vector<32x16xf32>
    %8 = arith.maximumf %6, %7 : vector<32x16xf32>
    %9 = vector.extract_strided_slice %5 {offsets = [32, 0], sizes = [4, 16], strides = [1, 1]} : vector<40x16xf32> to vector<4x16xf32>
    %c40 = arith.constant 40 : index
    %c0_6 = arith.constant 0 : index
    %10 = vector.load %arg2[%c40, %c0_6] : memref<112x128xf32, #tpu.memory_space<vmem>>, vector<64x32xf32>
    %c40_7 = arith.constant 40 : index
    %c0_8 = arith.constant 0 : index
    %11 = vector.load %arg3[%c40_7, %c0_8] : memref<112x1xf32, #tpu.memory_space<vmem>>, vector<64x1xf32>
    %cst_9 = arith.constant dense<0.000000e+00> : vector<64x16xf32>
    %12 = tpu.matmul %10, %8, %cst_9 {dimension_numbers = #tpu.dot_dimension_numbers<[1], [0], [0], [1], [0, 0, 1, 1], [], []>} : vector<64x32xf32>, vector<32x16xf32>, vector<64x16xf32> -> vector<64x16xf32>
    %13 = vector.broadcast %11 : vector<64x1xf32> to vector<64x16xf32>
    %14 = arith.addf %12, %13 : vector<64x16xf32>
    %cst_10 = arith.constant 0.000000e+00 : f32
    %15 = vector.broadcast %cst_10 : f32 to vector<64x16xf32>
    %16 = arith.maximumf %14, %15 : vector<64x16xf32>
    %c104 = arith.constant 104 : index
    %c0_11 = arith.constant 0 : index
    %17 = vector.load %arg2[%c104, %c0_11] : memref<112x128xf32, #tpu.memory_space<vmem>>, vector<4x64xf32>
    %c104_12 = arith.constant 104 : index
    %c0_13 = arith.constant 0 : index
    %18 = vector.load %arg3[%c104_12, %c0_13] : memref<112x1xf32, #tpu.memory_space<vmem>>, vector<4x1xf32>
    %cst_14 = arith.constant dense<0.000000e+00> : vector<4x16xf32>
    %19 = tpu.matmul %17, %16, %cst_14 {dimension_numbers = #tpu.dot_dimension_numbers<[1], [0], [0], [1], [0, 0, 1, 1], [], []>} : vector<4x64xf32>, vector<64x16xf32>, vector<4x16xf32> -> vector<4x16xf32>
    %20 = vector.broadcast %18 : vector<4x1xf32> to vector<4x16xf32>
    %21 = arith.addf %19, %20 : vector<4x16xf32>
    %22 = vector.extract_strided_slice %21 {offsets = [0, 0], sizes = [1, 16], strides = [1, 1]} : vector<4x16xf32> to vector<1x16xf32>
    %23 = vector.extract_strided_slice %21 {offsets = [1, 0], sizes = [1, 16], strides = [1, 1]} : vector<4x16xf32> to vector<1x16xf32>
    %24 = vector.extract_strided_slice %21 {offsets = [2, 0], sizes = [1, 16], strides = [1, 1]} : vector<4x16xf32> to vector<1x16xf32>
    %25 = arith.negf %24 : vector<1x16xf32>
    %26 = math.exp %25 : vector<1x16xf32>
    %cst_15 = arith.constant 1.000000e+00 : f32
    %27 = vector.broadcast %cst_15 : f32 to vector<1x16xf32>
    %28 = arith.addf %27, %26 : vector<1x16xf32>
    %29 = arith.divf %27, %28 : vector<1x16xf32>
    %cst_16 = arith.constant 4.000000e+00 : f32
    %30 = vector.broadcast %cst_16 : f32 to vector<1x16xf32>
    %31 = arith.mulf %30, %29 : vector<1x16xf32>
    %32 = vector.extract_strided_slice %21 {offsets = [3, 0], sizes = [1, 16], strides = [1, 1]} : vector<4x16xf32> to vector<1x16xf32>
    %33 = arith.negf %32 : vector<1x16xf32>
    %34 = math.exp %33 : vector<1x16xf32>
    %cst_17 = arith.constant 1.000000e+00 : f32
    %35 = vector.broadcast %cst_17 : f32 to vector<1x16xf32>
    %36 = arith.addf %35, %34 : vector<1x16xf32>
    %37 = arith.divf %35, %36 : vector<1x16xf32>
    %cst_18 = arith.constant 4.000000e+00 : f32
    %38 = vector.broadcast %cst_18 : f32 to vector<1x16xf32>
    %39 = arith.mulf %38, %37 : vector<1x16xf32>
    %40 = vector.extract_strided_slice %9 {offsets = [0, 0], sizes = [1, 16], strides = [1, 1]} : vector<4x16xf32> to vector<1x16xf32>
    %41 = vector.extract_strided_slice %9 {offsets = [1, 0], sizes = [1, 16], strides = [1, 1]} : vector<4x16xf32> to vector<1x16xf32>
    %42 = vector.extract_strided_slice %9 {offsets = [2, 0], sizes = [1, 16], strides = [1, 1]} : vector<4x16xf32> to vector<1x16xf32>
    %43 = vector.extract_strided_slice %9 {offsets = [3, 0], sizes = [1, 16], strides = [1, 1]} : vector<4x16xf32> to vector<1x16xf32>
    %44 = math.sin %42 : vector<1x16xf32>
    %45 = math.cos %42 : vector<1x16xf32>
    %cst_19 = arith.constant 4.000000e+01 : f32
    %46 = vector.broadcast %cst_19 : f32 to vector<1x16xf32>
    %47 = arith.subf %40, %46 : vector<1x16xf32>
    %cst_20 = arith.constant 1.500000e+01 : f32
    %48 = vector.broadcast %cst_20 : f32 to vector<1x16xf32>
    %49 = arith.subf %41, %48 : vector<1x16xf32>
    %50 = arith.mulf %47, %47 : vector<1x16xf32>
    %51 = arith.mulf %49, %49 : vector<1x16xf32>
    %52 = arith.addf %50, %51 : vector<1x16xf32>
    %cst_21 = arith.constant 3.600000e+01 : f32
    %53 = vector.broadcast %cst_21 : f32 to vector<1x16xf32>
    %54 = arith.subf %52, %53 : vector<1x16xf32>
    %cst_22 = arith.constant 2.000000e+00 : f32
    %55 = vector.broadcast %cst_22 : f32 to vector<1x16xf32>
    %56 = arith.mulf %55, %47 : vector<1x16xf32>
    %57 = arith.mulf %56, %43 : vector<1x16xf32>
    %58 = arith.mulf %57, %45 : vector<1x16xf32>
    %cst_23 = arith.constant 2.000000e+00 : f32
    %59 = vector.broadcast %cst_23 : f32 to vector<1x16xf32>
    %60 = arith.mulf %59, %49 : vector<1x16xf32>
    %61 = arith.mulf %60, %43 : vector<1x16xf32>
    %62 = arith.mulf %61, %44 : vector<1x16xf32>
    %63 = arith.addf %58, %62 : vector<1x16xf32>
    %cst_24 = arith.constant 2.000000e+00 : f32
    %64 = vector.broadcast %cst_24 : f32 to vector<1x16xf32>
    %65 = arith.mulf %64, %43 : vector<1x16xf32>
    %66 = arith.mulf %65, %43 : vector<1x16xf32>
    %cst_25 = arith.constant -2.000000e+00 : f32
    %67 = vector.broadcast %cst_25 : f32 to vector<1x16xf32>
    %68 = arith.mulf %67, %47 : vector<1x16xf32>
    %69 = arith.mulf %68, %43 : vector<1x16xf32>
    %70 = arith.mulf %69, %44 : vector<1x16xf32>
    %cst_26 = arith.constant 2.000000e+00 : f32
    %71 = vector.broadcast %cst_26 : f32 to vector<1x16xf32>
    %72 = arith.mulf %71, %49 : vector<1x16xf32>
    %73 = arith.mulf %72, %43 : vector<1x16xf32>
    %74 = arith.mulf %73, %45 : vector<1x16xf32>
    %75 = arith.addf %70, %74 : vector<1x16xf32>
    %cst_27 = arith.constant 0.000000e+00 : f32
    %76 = vector.broadcast %cst_27 : f32 to vector<1x16xf32>
    %77 = arith.subf %76, %75 : vector<1x16xf32>
    %cst_28 = arith.constant 2.000000e+00 : f32
    %78 = vector.broadcast %cst_28 : f32 to vector<1x16xf32>
    %79 = arith.mulf %78, %47 : vector<1x16xf32>
    %80 = arith.mulf %79, %45 : vector<1x16xf32>
    %cst_29 = arith.constant 2.000000e+00 : f32
    %81 = vector.broadcast %cst_29 : f32 to vector<1x16xf32>
    %82 = arith.mulf %81, %49 : vector<1x16xf32>
    %83 = arith.mulf %82, %44 : vector<1x16xf32>
    %84 = arith.addf %80, %83 : vector<1x16xf32>
    %cst_30 = arith.constant 0.000000e+00 : f32
    %85 = vector.broadcast %cst_30 : f32 to vector<1x16xf32>
    %86 = arith.subf %85, %84 : vector<1x16xf32>
    %87 = arith.addf %31, %39 : vector<1x16xf32>
    %88 = arith.mulf %87, %63 : vector<1x16xf32>
    %89 = arith.addf %66, %88 : vector<1x16xf32>
    %90 = arith.mulf %31, %39 : vector<1x16xf32>
    %91 = arith.mulf %90, %54 : vector<1x16xf32>
    %92 = arith.addf %89, %91 : vector<1x16xf32>
    %93 = arith.mulf %77, %22 : vector<1x16xf32>
    %94 = arith.mulf %86, %23 : vector<1x16xf32>
    %95 = arith.addf %93, %94 : vector<1x16xf32>
    %cst_31 = arith.constant 0.000000e+00 : f32
    %96 = vector.broadcast %cst_31 : f32 to vector<1x16xf32>
    %97 = arith.subf %96, %95 : vector<1x16xf32>
    %98 = arith.mulf %77, %77 : vector<1x16xf32>
    %99 = arith.mulf %86, %86 : vector<1x16xf32>
    %100 = arith.addf %98, %99 : vector<1x16xf32>
    %cst_32 = arith.constant 9.99999996E-13 : f32
    %101 = vector.broadcast %cst_32 : f32 to vector<1x16xf32>
    %102 = arith.maximumf %100, %101 : vector<1x16xf32>
    %103 = tpu.reciprocal %102 : vector<1x16xf32> -> vector<1x16xf32>
    %104 = arith.subf %97, %92 : vector<1x16xf32>
    %105 = arith.mulf %104, %103 : vector<1x16xf32>
    %cst_33 = arith.constant 0.000000e+00 : f32
    %106 = vector.broadcast %cst_33 : f32 to vector<1x16xf32>
    %107 = arith.maximumf %105, %106 : vector<1x16xf32>
    %cst_34 = arith.constant 0.000000e+00 : f32
    %108 = vector.broadcast %cst_34 : f32 to vector<1x16xf32>
    %109 = arith.subf %108, %22 : vector<1x16xf32>
    %110 = arith.mulf %107, %77 : vector<1x16xf32>
    %111 = arith.subf %109, %110 : vector<1x16xf32>
    %cst_35 = arith.constant 0.000000e+00 : f32
    %112 = vector.broadcast %cst_35 : f32 to vector<1x16xf32>
    %113 = arith.subf %112, %23 : vector<1x16xf32>
    %114 = arith.mulf %107, %86 : vector<1x16xf32>
    %115 = arith.subf %113, %114 : vector<1x16xf32>
    %116 = tpu.concatenate %111, %115 in 0 : vector<1x16xf32>, vector<1x16xf32> -> vector<2x16xf32>
    %c0_36 = arith.constant 0 : index
    %c0_37 = arith.constant 0 : index
    %117 = vector.load %arg4[%c0_36, %c0_37] : memref<2x16xf32, #tpu.memory_space<vmem>>, vector<2x16xf32>
    tpu.vector_store %arg4[%c0_36, %c0_37], %116 {strides = array<i32>} : memref<2x16xf32, #tpu.memory_space<vmem>>, vector<2x16xf32>,
    return
  }
  func.func @transform_0(%arg0: i32) -> (i32, i32) {
    %c0_i32 = arith.constant 0 : i32
    %c0_i32_0 = arith.constant 0 : i32
    return %arg0, %c0_i32 : i32, i32
  }
  func.func @transform_1(%arg0: i32) -> (i32, i32) {
    %c0_i32 = arith.constant 0 : i32
    %c0_i32_0 = arith.constant 0 : i32
    %c0_i32_1 = arith.constant 0 : i32
    return %c0_i32, %c0_i32_0 : i32, i32
  }
  func.func @transform_2(%arg0: i32) -> (i32, i32) {
    %c0_i32 = arith.constant 0 : i32
    %c0_i32_0 = arith.constant 0 : i32
    %c0_i32_1 = arith.constant 0 : i32
    return %c0_i32, %c0_i32_0 : i32, i32
  }
  func.func @transform_3(%arg0: i32) -> (i32, i32) {
    %c0_i32 = arith.constant 0 : i32
    %c0_i32_0 = arith.constant 0 : i32
    return %c0_i32, %arg0 : i32, i32
  }
}

</mosaic_0001>

<bundles_post_ra>
// kernel: tpu_custom_call.1
= control target key start
LH: loop header
LB: loop body
LE: loop exit
PB: predicated region body
PF: predicated region fallthrough
CT: control target
= control target key end

     0   :  { %vm52_vm0 = vcmask 39936   ;;  %v963_v2 = vmov 0.0|0.0   ;;  %vm964_vm2 = vmmov 0   ;;  %v965_v4 = vmov 0.0   ;;  %s1196_s0 = inlined_call_operand.vmem [shape: f32[16,5], index: 0, kind: input, shape index: {}]   ;;  %s1197_s1 = inlined_call_operand.vmem [shape: f32[112,128], index: 1, kind: input, shape index: {}]   ;;  %s1198_s2 = inlined_call_operand.vmem [shape: f32[112,1], index: 2, kind: input, shape index: {}]   ;;  %s1199_s3 = inlined_call_operand.hbm [shape: f32[2,16], index: 3, kind: output, shape index: {}]  }
   0x1   :  { %v15_v0 = vld [vmem:[%s1196_s0] sm:$0xff]  ;;  %v16_v1 = vld [vmem:[%s1196_s0 + $0x8] sm:$0xff]  ;;  %888 = vmatprep.subr.bf16.mxu0 %v963_v2  ;;  %vm890_vm1 = vmpackc.low %vm52_vm0, %vm52_vm0  ;;  %834 = vmatprep.mubr.msk.f32.mxu0 %vm964_vm2, %v965_v4  ;;  %v966_v5 = vmov 0  }
   0x2   :  { %v889_v3 = vpack.c.bf16 %v16_v1, %v15_v0  ;;  %927 = vset.pattern.permute.xlu0 %v966_v5  ;;  %928 = vset.pattern.permute.xlu1 %v966_v5  ;;  %v22_v6 = vld [vmem:[%s1198_s2] sm:$0xff]  ;;  %v24_v7 = vld [vmem:[%s1198_s2 + $0x10] sm:$0xff]  ;;  %v23_v8 = vld [vmem:[%s1198_s2 + $0x8] sm:$0xff] }
   0x3   :  { %29 = vperm.xlu0 %927, %v22_v6   ;;  %39 = vperm.xlu1 %928, %v24_v7   ;;  %v25_v9 = vld [vmem:[%s1198_s2 + $0x18] sm:$0xff]  ;;  %v17_v10 = vld [vmem:[%s1197_s1] sm:$0xff] }
   0x4   :  { %891 = vmatpush3.bf16.xpose.msk.msra.mxu0 %vm890_vm1, %v889_v3 }
   0x5   :  { %8 = vsyncpa [#allocation3], 0  ;;  %v176_v11 = vld [vmem:[%s1198_s2 + $0x28] sm:$0xff]  ;;  %v177_v12 = vld [vmem:[%s1198_s2 + $0x30] sm:$0xff]  ;;  %vm224_vm3 = vcmask 261120  }
   0x6   :  { %v18_v13 = vld [vmem:[%s1197_s1 + $0x8] sm:$0xff]  ;;  %v178_v14 = vld [vmem:[%s1198_s2 + $0x38] sm:$0xff]  ;;  %v179_v15 = vld [vmem:[%s1198_s2 + $0x40] sm:$0xff] }
   0x7   :  { %34 = vperm.xlu0 %927, %v23_v8   ;;  %44 = vperm.xlu1 %928, %v25_v9   ;;  %v19_v16 = vld [vmem:[%s1197_s1 + $0x10] sm:$0xff]  ;;  %v180_v17 = vld [vmem:[%s1198_s2 + $0x48] sm:$0xff]  ;;  %v20_v19 = vld [vmem:[%s1197_s1 + $0x18] sm:$0xff] }
   0x8   :  { %v181_v18 = vld [vmem:[%s1198_s2 + $0x50] sm:$0xff]  ;;  %v182_v20 = vld [vmem:[%s1198_s2 + $0x58] sm:$0xff]  ;;  %v183_v21 = vld [vmem:[%s1198_s2 + $0x60] sm:$0xff] }
   0x9   :  { %v21_v22 = vld [vmem:[%s1197_s1 + $0x20] sm:$0xff]  ;;  %v363_v24 = vld [vmem:[%s1198_s2 + $0x68] sm:$0xf]  ;;  %v169_v57 = vld [vmem:[%s1197_s1 + $0x30] sm:$0xff] }
   0xa   :  { %v26_v23 = vld [vmem:[%s1198_s2 + $0x20] sm:$0xff]  ;;  %v168_v25 = vld [vmem:[%s1197_s1 + $0x28] sm:$0xff]  ;;  %v170_v58 = vld [vmem:[%s1197_s1 + $0x38] sm:$0xff] }
   0xb   :  { %835 = vmatmul.mubr.msk.f32.vlgmr.msra.gmra.mrb[0].mxu0 %vm52_vm0, %v17_v10  ;;  %186 = vperm.xlu0 %927, %v176_v11   ;;  %v171_v61 = vld [vmem:[%s1197_s1 + $0x40] sm:$0xff]  ;;  %v172_v62 = vld [vmem:[%s1197_s1 + $0x48] sm:$0xff]  ;;  %v173_v1 = vld [vmem:[%s1197_s1 + $0x50] sm:$0xff]  ;;  %v967_v11 = vmov 683565275  }
   0xc   :  { %837 = vmatprep.mubr.msk.f32.mxu0 %vm964_vm2, %v965_v4  ;;  %191 = vperm.xlu1 %928, %v177_v12   ;;  %v174_v5 = vld [vmem:[%s1197_s1 + $0x58] sm:$0xff]  ;;  %v175_v9 = vld [vmem:[%s1197_s1 + $0x60] sm:$0xff] }
   0xd   :  { %857 = vmatprep.mubr.msk.f32.mxu1 %vm224_vm3, %v168_v25  ;;  %v972_v25 = vmov 1326507024  }
   0xf   :  { %838 = vmatmul.mubr.msk.f32.gmra.mrb[2].mxu0 %vm52_vm0, %v18_v13  ;;  %196 = vperm.xlu0 %927, %v178_v14   ;;  %v968_v13 = vmov 2475754826  }
  0x10   :  { %840 = vmatprep.mubr.msk.f32.mxu0 %vm964_vm2, %v965_v4  ;;  %201 = vperm.xlu1 %928, %v179_v15  }
  0x13   :  { %841 = vmatmul.mubr.msk.f32.gmra.mrb[4].mxu0 %vm52_vm0, %v19_v16  ;;  %206 = vperm.xlu0 %927, %v180_v17   ;;  %v969_v16 = vmov 2131351028  }
  0x14   :  { %843 = vmatprep.mubr.msk.f32.mxu0 %vm964_vm2, %v965_v4  ;;  %211 = vperm.xlu1 %928, %v181_v18  }
  0x17   :  { %844 = vmatmul.mubr.msk.f32.gmra.mrb[6].mxu0 %vm52_vm0, %v20_v19  ;;  %216 = vperm.xlu0 %927, %v182_v20   ;;  %v970_v19 = vmov 2102212464  }
  0x18   :  { %846 = vmatprep.mubr.msk.f32.mxu0 %vm964_vm2, %v965_v4  ;;  %221 = vperm.xlu1 %928, %v183_v21  }
  0x1b   :  { %847 = vmatmul.mubr.msk.f32.gmra.mrb[8].mxu0 %vm52_vm0, %v21_v22  ;;  %49 = vperm.xlu0 %927, %v26_v23   ;;  %v971_v22 = vmov 920167782  }
  0x1c   :  { %366 = vperm.xlu1 %928, %v363_v24  }
  0x82   :  { %v30_v26 = vpop.permute.xlu0 %29  ;;  %v40_v37 = vpop.permute.xlu1 %39 }
  0x86   :  { %v35_v27 = vpop.permute.xlu0 %34  ;;  %v45_v45 = vpop.permute.xlu1 %44 }
  0x8a   :  { %v1079_v28 = vpop.permute.xlu0 %186 }
  0x8e   :  { %v1081_v29 = vpop.permute.xlu0 %196 }
  0x92   :  { %v1083_v33 = vpop.permute.xlu0 %206 }
  0x96   :  { %v1085_v43 = vpop.permute.xlu0 %216 }
  0x9a   :  { %v50_v51 = vpop.permute.xlu0 %49 }
  0xde   :  { %v140_v30 = vpop.f32.mrb[0].mxu0 }
  0xdf   :  { %v836_v31 = vpop.f32.mrb[1].mxu0  ;;  %v141_v32 = vadd.f32 %v140_v30, %v30_v26 }
  0xe1   :  { %v164_v38 = vmax.f32 %v141_v32, 0.0 }
  0xe2   :  { %v145_v34 = vpop.f32.mrb[2].mxu0 }
  0xe3   :  { %v146_v35 = vadd.f32 %v145_v34, %v35_v27  ;;  %v839_v36 = vpop.f32.mrb[3].mxu0 }
  0xe5   :  { %v165_v39 = vmax.f32 %v146_v35, 0.0 }
  0xe6   :  { %v150_v40 = vpop.f32.mrb[4].mxu0 }
  0xe7   :  { %v842_v41 = vpop.f32.mrb[5].mxu0  ;;  %v892_v42 = vpack.c.bf16 %v165_v39, %v164_v38  ;;  %v151_v44 = vadd.f32 %v150_v40, %v40_v37 }
  0xe9   :  { %893 = vmatprep.subr.bf16.mxu1 %v892_v42  ;;  %v166_v49 = vmax.f32 %v151_v44, 0.0 }
  0xea   :  { %v155_v46 = vpop.f32.mrb[6].mxu0  ;;  %895 = vmatpush3.bf16.msra.mxu1 %v892_v42 }
  0xeb   :  { %v156_v47 = vadd.f32 %v155_v46, %v45_v45  ;;  %v845_v48 = vpop.f32.mrb[7].mxu0 }
  0xed   :  { %v167_v50 = vmax.f32 %v156_v47, 0.0 }
  0xee   :  { %v160_v52 = vpop.f32.mrb[8].mxu0 }
  0xef   :  { %v896_v53 = vpack.c.bf16 %v167_v50, %v166_v49  ;;  %v1087_v54 = vadd.f32 %v160_v52, %v50_v51  ;;  %v848_v55 = vpop.f32.mrb[9].mxu0 }
  0xf1   :  { %897 = vmatprep.subr.bf16.mxu1 %v896_v53  ;;  %v453_v56 = vand.u32 2139095040, %v1087_v54  ;;  %v450_v0 = vand.u32 2147483647, %v1087_v54  ;;  %vm452_vm11 = vcmp.lt.s32.totalorder %v1087_v54, 0 }
  0xf2   :  { %899 = vmatpush3.bf16.msra.mxu1 %v896_v53 }
  0xf3   :  { %900 = vmatprep.subr.bf16.mxu1 %v963_v2  ;;  %v454_v59 = vshrl.u32 %v453_v56, 23  ;;  %v457_v7 = vand.u32 8388607, %v450_v0  ;;  %vm451_vm12 = vcmp.le.f32.partialorder %v450_v0, 0.7853982 }
  0xf5   :  { %858 = vmatmul.mubr.msk.f32.vlgmr.msra.gmra.mrb[0].mxu1 %vm224_vm3, %v169_v57  ;;  %v791_v60 = vadd.s32 4294967169, %v454_v59  ;;  %v458_v27 = vor.u32 8388608, %v457_v7 }
  0xf6   :  { %860 = vmatprep.mubr.msk.f32.mxu1 %vm224_vm3, %v170_v58 }
  0xf7   :  { %v460_v63 = vadd.s32 1, %v791_v60  ;;  %v498_v45 = vshll.u32 %v458_v27, 8  ;;  %v1142_v27 = vadd.f32 -15.0, %v1087_v54 }
  0xf9   :  { %861 = vmatmul.mubr.msk.f32.gmra.mrb[2].mxu1 %vm224_vm3, %v171_v61  ;;  %vm461_vm4 = vcmp.gt.s32.totalorder %v460_v63, 0 }
  0xfa   :  { %863 = vmatprep.mubr.msk.f32.mxu1 %vm224_vm3, %v172_v62  ;;  %v462_v3 = vsel %vm461_vm4, %v460_v63, 0  ;;  %vm369_vm4 = vcmask 523264  }
  0xfb   :  { %v464_v6 = vand.u32 31, %v462_v3  ;;  %v463_v10 = vshrl.u32 %v462_v3, 5 }
  0xfd   :  { %864 = vmatmul.mubr.msk.f32.gmra.mrb[4].mxu1 %vm224_vm3, %v173_v1  ;;  %v465_v8 = vsub.s32 32, %v464_v6  ;;  %v467_v12 = vshll.u32 %v967_v11, %v464_v6  ;;  %v470_v14 = vshll.u32 %v968_v13, %v464_v6  ;;  %v473_v18 = vshll.u32 %v969_v16, %v464_v6 }
  0xfe   :  { %866 = vmatprep.mubr.msk.f32.mxu1 %vm224_vm3, %v174_v5  ;;  %v476_v21 = vshll.u32 %v970_v19, %v464_v6  ;;  %v479_v24 = vshll.u32 %v971_v22, %v464_v6  ;;  %vm482_vm5 = vcmp.lt.s32.totalorder %v463_v10, 1  ;;  %vm485_vm6 = vcmp.lt.s32.totalorder %v463_v10, 4 }
  0xff   :  { %v468_v15 = vshrl.u32 %v968_v13, %v465_v8  ;;  %v471_v17 = vshrl.u32 %v969_v16, %v465_v8  ;;  %v474_v20 = vshrl.u32 %v970_v19, %v465_v8  ;;  %v477_v23 = vshrl.u32 %v971_v22, %v465_v8 }
 0x100   :  { %v480_v26 = vshrl.u32 %v972_v25, %v465_v8  ;;  %v466_v39 = vshrl.u32 %v967_v11, %v465_v8  ;;  %vm484_vm7 = vcmp.lt.s32.totalorder %v463_v10, 3  ;;  %vm483_vm8 = vcmp.lt.s32.totalorder %v463_v10, 2 }
 0x101   :  { %867 = vmatmul.mubr.msk.f32.gmra.mrb[6].mxu1 %vm224_vm3, %v175_v9  ;;  %v469_v30 = vor.u32 %v468_v15, %v467_v12  ;;  %v472_v31 = vor.u32 %v471_v17, %v470_v14  ;;  %v475_v32 = vor.u32 %v474_v20, %v473_v18  ;;  %v478_v34 = vor.u32 %v477_v23, %v476_v21 }
 0x102   :  { %885 = vmatprep.mubr.msk.f32.mxu1 %vm964_vm2, %v965_v4  ;;  %v481_v35 = vor.u32 %v480_v26, %v479_v24  ;;  %v1139_v26 = vadd.f32 -40.0, %v1087_v54  ;;  %vm542_vm3 = vweird.f32 %v1087_v54 }
 0x103   :  { %v487_v36 = vsel %vm485_vm6, %v475_v32, 2102212464  ;;  %v490_v37 = vsel %vm482_vm5, %v469_v30, %v472_v31  ;;  %v494_v38 = vsel %vm482_vm5, %v472_v31, %v475_v32  ;;  %v491_v40 = vsel %vm485_vm6, %v478_v34, 920167782 }
 0x104   :  { %v495_v41 = vsel %vm485_vm6, %v481_v35, 1326507024  ;;  %v492_v42 = vsel %vm484_vm7, %v475_v32, %v491_v40  ;;  %v486_v46 = vsel %vm482_vm5, %v466_v39, %v469_v30  ;;  %v488_v47 = vsel %vm484_vm7, %v472_v31, %v487_v36 }
 0x105   :  { %v496_v44 = vsel %vm484_vm7, %v478_v34, %v495_v41  ;;  %v493_v48 = vsel %vm483_vm8, %v490_v37, %v492_v42  ;;  %v489_v53 = vsel %vm483_vm8, %v486_v46, %v488_v47  ;;  %v668_v34 = vrot.slane %v1087_v54, 3 }
 0x106   :  { %v497_v49 = vsel %vm483_vm8, %v494_v38, %v496_v44  ;;  %v1127_v51 = vmul.u32.u64.low %v498_v45, %v493_v48  ;;  %v1128_v52 = vmul.u32.u64.high %v498_v45, %v493_v48, %v1127_v51  ;;  %v505_v56 = vmul.u32 %v498_v45, %v489_v53 }
 0x107   :  { %v1124_v4 = vmul.u32.u64.low %v498_v45, %v497_v49  ;;  %v1125_v50 = vmul.u32.u64.high %v498_v45, %v497_v49, %v1124_v4  ;;  %v666_v36 = vmul.f32 2.0, %v1139_v26  ;;  %v675_v37 = vmul.f32 2.0, %v1142_v27 }
 0x108   :  { %v508_v55 = vadd.s32 1, %v1128_v52  ;;  %v676_v38 = vrot.slane %v1087_v54, 2  ;;  %v689_v40 = vmul.f32 -2.0, %v1139_v26  ;;  %vm756_vm5 = vcmask 1040384  }
 0x109   :  { %vm507_vm9 = vc.u32 %v1125_v50, %v1127_v51  ;;  %v506_v7 = vadd.s32 %v1127_v51, %v1125_v50  ;;  %v670_v48 = vmul.f32 %v668_v34, %v666_v36  ;;  %vm758_vm6 = vcmask 123904  }
 0x10a   :  { %v509_v57 = vsel %vm507_vm9, %v508_v55, %v1128_v52  ;;  %v678_v50 = vmul.f32 %v676_v38, %v675_v37  ;;  %v690_v51 = vmul.f32 %v689_v40, %v668_v34 }
 0x10b   :  { %v510_v58 = vadd.s32 %v509_v57, %v505_v56 }
 0x10d   :  { %v511_v59 = vadd.s32 536870912, %v510_v58 }
 0x10f   :  { %v512_v60 = vshrl.u32 %v511_v59, 30 }
 0x111   :  { %v513_v61 = vshll.u32 %v512_v60, 30  ;;  %v536_v19 = vsub.s32 4, %v512_v60 }
 0x113   :  { %v514_v62 = vsub.s32 %v510_v58, %v513_v61  ;;  %v537_v22 = vsel %vm452_vm11, %v536_v19, %v512_v60 }
 0x114   :  { %v539_v24 = vsel %vm451_vm12, 0, %v537_v22 }
 0x115   :  { %v516_v63 = vsub.s32 0, %v514_v62  ;;  %v543_v25 = vadd.s32 3, %v539_v24  ;;  %v647_v31 = vand.u32 3, %v539_v24 }
 0x117   :  { %v792_v1 = vmin.u32 %v516_v63, %v514_v62  ;;  %v544_v30 = vand.u32 3, %v543_v25  ;;  %vm652_vm14 = vcmp.eq.s32.totalorder %v647_v31, 2  ;;  %vm649_vm0 = vcmp.eq.s32.totalorder %v647_v31, 0 }
 0x118   :  { %vm648_vm2 = vcmp.lt.s32.totalorder %v647_v31, 2 }
 0x119   :  { %v518_v3 = vclz %v792_v1  ;;  %vm549_vm13 = vcmp.eq.s32.totalorder %v544_v30, 2  ;;  %vm546_vm15 = vcmp.eq.s32.totalorder %v544_v30, 0  ;;  %vm545_vm1 = vcmp.lt.s32.totalorder %v544_v30, 2 }
 0x11b   :  { %v793_v5 = vadd.s32 4294967294, %v518_v3 }
 0x11d   :  { %vm794_vm10 = vcmp.lt.s32.totalorder %v793_v5, 0 }
 0x11e   :  { %v521_v6 = vsel %vm794_vm10, 0, %v793_v5 }
 0x11f   :  { %v522_v8 = vsub.s32 32, %v521_v6  ;;  %v526_v9 = vsub.s32 4294967266, %v521_v6  ;;  %v523_v10 = vshll.u32 %v514_v62, %v521_v6 }
 0x121   :  { %v524_v11 = vshrl.u32 %v506_v7, %v522_v8  ;;  %v527_v12 = vadd.s32 127, %v526_v9 }
 0x123   :  { %v525_v13 = vor.u32 %v524_v11, %v523_v10  ;;  %v528_v14 = vshll.u32 %v527_v12, 23 }
 0x125   :  { %v529_v15 = vor.u32 4788187, %v528_v14  ;;  %v532_v17 = vcvt.s32.f32 %v525_v13  ;;  %v192_v13 = vpop.permute.xlu1 %191 }
 0x127   :  { %v530_v16 = vand.u32 2147483647, %v529_v15 }
 0x129   :  { %v533_v18 = vmul.f32 %v532_v17, %v530_v16  ;;  %v202_v14 = vpop.permute.xlu1 %201 }
 0x12b   :  { %v534_v20 = vxor.u32 2147483648, %v533_v18 }
 0x12d   :  { %v535_v21 = vsel %vm452_vm11, %v534_v20, %v533_v18  ;;  %v212_v24 = vpop.permute.xlu1 %211 }
 0x12e   :  { %v538_v23 = vsel %vm451_vm12, %v1087_v54, %v535_v21 }
 0x12f   :  { %929 = vcosq.f32 %v538_v23 }
 0x130   :  { %931 = vsinq.f32 %v538_v23 }
 0x131   :  { %v222_v38 = vpop.permute.xlu1 %221 }
 0x139   :  { %v930_v32 = vpop.eup %929 }
 0x13a   :  { %v932_v0 = vpop.eup %931  ;;  %v550_v35 = vxor.u32 2147483648, %v930_v32 }
 0x13b   :  { %v547_v39 = vxor.u32 2147483648, %v932_v0 }
 0x13c   :  { %v551_v41 = vsel %vm549_vm13, %v550_v35, %v932_v0  ;;  %v654_v42 = vsel %vm652_vm14, %v550_v35, %v932_v0 }
 0x13d   :  { %v548_v44 = vsel %vm546_vm15, %v930_v32, %v547_v39  ;;  %v651_v45 = vsel %vm649_vm0, %v930_v32, %v547_v39 }
 0x13e   :  { %v552_v46 = vsel %vm545_vm1, %v548_v44, %v551_v41  ;;  %v655_v47 = vsel %vm648_vm2, %v651_v45, %v654_v42 }
 0x13f   :  { %v553_v49 = vsel %vm542_vm3, nan, %v552_v46  ;;  %v656_v4 = vsel %vm542_vm3, nan, %v655_v47 }
 0x140   :  { %v672_v52 = vrot.slane %v656_v4, 2  ;;  %v680_v53 = vrot.slane %v553_v49, 1  ;;  %v691_v55 = vrot.slane %v553_v49, 2  ;;  %v694_v56 = vrot.slane %v656_v4, 1 }
 0x142   :  { %v674_v57 = vmul.f32 %v672_v52, %v670_v48  ;;  %v682_v58 = vmul.f32 %v680_v53, %v678_v50  ;;  %v693_v59 = vmul.f32 %v691_v55, %v690_v51  ;;  %v696_v60 = vmul.f32 %v694_v56, %v678_v50  ;;  %v367_v48 = vpop.permute.xlu1 %366 }
 0x143   :  { %v702_v61 = vmul.f32 %v672_v52, %v666_v36  ;;  %v703_v62 = vmul.f32 %v680_v53, %v675_v37 }
 0x144   :  { %v684_v63 = vrot.slane %v682_v58, 1  ;;  %v698_v1 = vrot.slane %v696_v60, 1 }
 0x145   :  { %v705_v3 = vrot.slane %v703_v62, 1 }
 0x146   :  { %v1150_v5 = vadd.f32 %v684_v63, %v674_v57  ;;  %v700_v6 = vadd.f32 %v698_v1, %v693_v59  ;;  %v660_v57 = vmul.f32 %v1142_v27, %v1142_v27  ;;  %v659_v59 = vmul.f32 %v1139_v26, %v1139_v26 }
 0x147   :  { %v707_v7 = vadd.f32 %v705_v3, %v702_v61  ;;  %v687_v3 = vmul.f32 2.0, %v1087_v54 }
 0x148   :  { %v1152_v8 = vsub.f32 0.0, %v700_v6  ;;  %v662_v58 = vrot.slane %v660_v57, 1 }
 0x149   :  { %v1154_v9 = vsub.f32 0.0, %v707_v7 }
 0x14a   :  { %v737_v10 = vmul.f32 %v1152_v8, %v1152_v8  ;;  %v664_v60 = vadd.f32 %v662_v58, %v659_v59 }
 0x14b   :  { %v738_v11 = vmul.f32 %v1154_v9, %v1154_v9 }
 0x14c   :  { %v801_v63 = vadd.f32 -36.0, %v664_v60 }
 0x14d   :  { %v1160_v12 = vadd.f32 %v738_v11, %v737_v10  ;;  %v714_v10 = vrot.slane %v1150_v5, 6 }
 0x14f   :  { %v740_v6 = vmax.f32 %v1160_v12, 1e-12 }
 0x1c8   :  { %v859_v15 = vpop.f32.mrb[0].mxu1 }
 0x1c9   :  { %v321_v16 = vadd.f32 %v859_v15, %v192_v13  ;;  %v315_v17 = vpop.f32.mrb[1].mxu1  ;;  %v723_v13 = vrot.slane %v801_v63, 6  ;;  %v688_v15 = vmul.f32 %v687_v3, %v1087_v54 }
 0x1ca   :  { %v316_v18 = vadd.f32 %v315_v17, %v1079_v28 }
 0x1cb   :  { %v355_v19 = vmax.f32 %v321_v16, 0.0 }
 0x1cc   :  { %v354_v20 = vmax.f32 %v316_v18, 0.0  ;;  %v862_v21 = vpop.f32.mrb[2].mxu1 }
 0x1cd   :  { %v331_v22 = vadd.f32 %v862_v21, %v202_v14  ;;  %v325_v23 = vpop.f32.mrb[3].mxu1 }
 0x1ce   :  { %v901_v25 = vpack.c.bf16 %v355_v19, %v354_v20  ;;  %v326_v30 = vadd.f32 %v325_v23, %v1081_v29 }
 0x1cf   :  { %v357_v31 = vmax.f32 %v331_v22, 0.0 }
 0x1d0   :  { %v356_v32 = vmax.f32 %v326_v30, 0.0  ;;  %v865_v34 = vpop.f32.mrb[4].mxu1  ;;  %902 = vmatpush3.bf16.msra.mxu1 %v901_v25 }
 0x1d1   :  { %v341_v0 = vadd.f32 %v865_v34, %v212_v24  ;;  %v335_v35 = vpop.f32.mrb[5].mxu1  ;;  %903 = vmatprep.subr.bf16.mxu1 %v963_v2 }
 0x1d2   :  { %v904_v36 = vpack.c.bf16 %v357_v31, %v356_v32  ;;  %v336_v28 = vadd.f32 %v335_v35, %v1083_v33  ;;  %v362_v33 = vld [vmem:[%s1197_s1 + $0x68] sm:$0xf]  ;;  %s973_s1 = smov [#allocation2]  }
 0x1d3   :  { %v359_v37 = vmax.f32 %v341_v0, 0.0  ;;  %s766_s15 = sshll.u32 %s973_s1, 4  ;;  %s767_s15 = int_to_ptr.vmem [resolvable:$true] %s766_s15 }
 0x1d4   :  { %v358_v39 = vmax.f32 %v336_v28, 0.0  ;;  %v868_v40 = vpop.f32.mrb[6].mxu1  ;;  %905 = vmatpush3.bf16.msra.mxu1 %v904_v36  ;;  %s939_s16 = scalar_lea.vmem %s767_s15, 32  ;;  %p944_p1 = scmp.lt.s32.totalorder %s767_s15, %s767_s15 }
 0x1d5   :  { %v351_v41 = vadd.f32 %v868_v40, %v222_v38  ;;  %v345_v42 = vpop.f32.mrb[7].mxu1  ;;  %906 = vmatprep.subr.bf16.mxu1 %v963_v2  ;;  %p940_p0 = scmp.ne.s32.totalorder %s767_s15, %s939_s16  ;;  %p945_p2 = scmp.lt.s32.totalorder %s939_s16, %s939_s16 }
 0x1d6   :  { %v907_v29 = vpack.c.bf16 %v359_v37, %v358_v39  ;;  %v346_v44 = vadd.f32 %v345_v42, %v1085_v43 }
 0x1d7   :  { %v361_v45 = vmax.f32 %v351_v41, 0.0  ;;  %p946_p3 = por %p945_p2, %p944_p1 }
 0x1d8   :  { %v360_v46 = vmax.f32 %v346_v44, 0.0  ;;  %908 = vmatpush3.bf16.msra.mxu1 %v907_v29 }
 0x1d9   :  { %909 = vmatprep.subr.bf16.mxu1 %v963_v2  ;;  %p947_p4 = pnand %p946_p3, %p940_p0 }
 0x1da   :  { %v910_v47 = vpack.c.bf16 %v361_v45, %v360_v46 }
 0x1dc   :  { %911 = vmatpush3.bf16.msra.mxu1 %v910_v47 }
 0x1df   :  { %886 = vmatmul.mubr.msk.f32.vlgmr.msra.gmra.mrb[8].mxu1 %vm369_vm4, %v362_v33 }
 0x2b2   :  { %v439_v49 = vpop.f32.mrb[8].mxu1 }
 0x2b3   :  { %v440_v4 = vadd.f32 %v439_v49, %v367_v48  ;;  %v887_v50 = vpop.f32.mrb[9].mxu1 }
 0x2b5   :  { %v790_v51 = vmul.f32 -1.442695, %v440_v4  ;;  %v730_v43 = vmul.f32 %v1152_v8, %v440_v4  ;;  %v732_v52 = vrot.slane %v440_v4, 1  ;;  %v748_v24 = vsub.f32 0.0, %v440_v4 }
 0x2b7   :  { %933 = vpow2.f32 %v790_v51  ;;  %v734_v53 = vmul.f32 %v732_v52, %v1154_v9 }
 0x2b9   :  { %v735_v2 = vadd.f32 %v734_v53, %v730_v43 }
 0x2bb   :  { %v736_v19 = vsub.f32 0.0, %v735_v2 }
 0x2c1   :  { %v934_v55 = vpop.eup %933 }
 0x2c2   :  { %v446_v56 = vadd.f32 1.0, %v934_v55 }
 0x2c4   :  { %935 = vrcp.f32 %v446_v56 }
 0x2c5   :  { %937 = vrcp.f32 %v740_v6 }
 0x2ce   :  { %v936_v61 = vpop.eup %935 }
 0x2cf   :  { %v449_v62 = vmul.f32 4.0, %v936_v61  ;;  %v938_v22 = vpop.eup %937 }
 0x2d1   :  { %v710_v1 = vrot.slane %v449_v62, 1 }
 0x2d3   :  { %v712_v7 = vadd.f32 %v710_v1, %v449_v62  ;;  %v721_v11 = vmul.f32 %v710_v1, %v449_v62 }
 0x2d5   :  { %v716_v27 = vmul.f32 %v714_v10, %v712_v7  ;;  %v725_v14 = vmul.f32 %v723_v13, %v721_v11 }
 0x2d7   :  { %v718_v26 = vrot.slane %v716_v27, 7  ;;  %v727_v17 = vrot.slane %v725_v14, 7 }
 0x2d9   :  { %v720_v16 = vadd.f32 %v718_v26, %v688_v15 }
 0x2db   :  { %v729_v18 = vadd.f32 %v727_v17, %v720_v16 }
 0x2dd   :  { %v743_v20 = vrot.slane %v729_v18, 3 }
 0x2df   :  { %v745_v21 = vsub.f32 %v736_v19, %v743_v20 }
 0x2e1   :  { %v746_v23 = vmul.f32 %v938_v22, %v745_v21 }
 0x2e3   :  { %v747_v12 = vmax.f32 %v746_v23, 0.0 }
 0x2e5   :  { %v749_v5 = vmul.f32 %v747_v12, %v1152_v8  ;;  %v751_v25 = vmul.f32 %v747_v12, %v1154_v9 }
 0x2e7   :  { %v750_v30 = vsub.f32 %v748_v24, %v749_v5  ;;  %v753_v31 = vrot.slane %v751_v25, 7 }
 0x2e9   :  { %v755_v54 = vsub.f32 %v748_v24, %v753_v31 }
 0x2eb   :  { %v757_v32 = vsel %vm756_vm5, %v750_v30, %v755_v54 }
 0x2ec   :  { %759 = vst.msk [vmem:[#allocation2] sm:$0x3] %vm758_vm6, %v757_v32 }
 0x2ed   :  { %950 = shalt.err (!%p947_p4)
}
 0x2ee   :  { %s951_s18 = scalar_lea.hbm %s1199_s3, 32 }
 0x2ef   :  { %p952_p5 = scmp.ne.s32.totalorder %s1199_s3, %s951_s18  ;;  %p955_p6 = scmp.lt.u32.totalorder %s951_s18, %s1199_s3 }
 0x2f1   :  { %p957_p7 = pnand %p955_p6, %p952_p5 }
 0x2f3   :  { %960 = shalt.err (!%p957_p7)
}
 0x2f4   :  { %769 = dma.vmem_to_hbm [thread:$0]  %s767_s15, 32, %s1199_s3, [#allocation3]  }
 0x2f5   :  { %961 = dma.done.wait [#allocation3], 32  }
 0x2f6   :  { %962 = vsyncadd [#allocation3], 4294967264 }
 0x2f7   :  { %773 = vsyncpa [#allocation3], 1 }

</bundles_post_ra>
